<compile_context>
chip_gen: v5e
topology: v5e:2x2
jax: 0.10.0
libtpu: 0.0.40
codegen_flags: <defaults>
</compile_context>

<pallas_src>
import functools

import jax
import jax.numpy as jnp
from jax import lax
from jax.experimental import pallas as pl
from jax.experimental.pallas import tpu as pltpu


def _tico_kernel(za_ref, c_ref, cnew_ref, lpart_ref, *, beta, inv_n, td):
    """One (td x td) tile of B = z_a^T z_a / N, EMA update, loss partial."""
    gj = pl.program_id(1)
    n, d = za_ref.shape

    if td == d:
        # untiled case (common for num_features=256): no dynamic slicing.
        za_i = za_ref[...]
        za_j = za_i
    else:
        i0 = pl.multiple_of(pl.program_id(0) * td, td)
        j0 = pl.multiple_of(gj * td, td)
        za_i = za_ref[:, pl.ds(i0, td)]
        za_j = za_ref[:, pl.ds(j0, td)]

    # B tile = (z_a^T z_a / N)[i_blk, j_blk]; contract the batch axis directly
    # so no transpose is materialized; accumulate in f32 on the MXU.
    b_tile = lax.dot_general(
        za_i, za_j,
        dimension_numbers=(((0,), (0,)), ((), ())),
        preferred_element_type=jnp.float32) * inv_n

    # EMA covariance update for this tile.
    c_new = beta * c_ref[...] + (1.0 - beta) * b_tile
    cnew_ref[...] = c_new

    # covariance-contrast partial:  sum over tiles of sum(B ⊙ C_new)
    #   == mean_i (z_a C_new z_a^T)_ii      (rho is applied in the wrapper)
    # One SMEM partial per i row-block -> the i grid axis stays independent.
    @pl.when(gj == 0)
    def _():
        lpart_ref[0, 0] = 0.0

    lpart_ref[0, 0] += jnp.sum(b_tile * c_new)


def _pick_tile(d, pref):
    """Largest multiple-of-128 divisor of d not exceeding `pref` (or d itself)."""
    if d <= pref:
        return d
    t = (pref // 128) * 128
    while t >= 128:
        if d % t == 0:
            return t
        t -= 128
    return d


@functools.partial(jax.jit,
                   static_argnames=("beta", "rho", "tile", "use_bf16_matmul"))
def tico_loss_pallas(z_a, z_b, C_old, beta=0.9, rho=8.0, tile=None,
                     use_bf16_matmul=None):
    """Returns (loss_scalar, C_new). C_old is the EMA covariance state."""
    n, d = z_a.shape
    assert n > 1, "batch size must be > 1"
    assert z_a.shape == z_b.shape
    assert C_old.shape == (d, d)

    if use_bf16_matmul is None:
        # keep bf16 inputs in bf16 for the MXU; f32 inputs stay f32 by default
        # for parity with the f32 PyTorch reference (flip on when MXU-bound).
        use_bf16_matmul = (jnp.dtype(z_a.dtype) == jnp.dtype(jnp.bfloat16))
    mm_dtype = jnp.bfloat16 if use_bf16_matmul else jnp.float32

    # ---- prologue in plain XLA: O(N*D) elementwise + small reductions ------
    za32 = z_a.astype(jnp.float32)
    zb32 = z_b.astype(jnp.float32)
    # torch.nn.functional.normalize(x, dim=1): x / max(||x||, 1e-12)
    sa = lax.rsqrt(jnp.maximum(jnp.sum(za32 * za32, axis=1, keepdims=True), 1e-24))
    sb = lax.rsqrt(jnp.maximum(jnp.sum(zb32 * zb32, axis=1, keepdims=True), 1e-24))
    za_n = za32 * sa
    invariance = 1.0 - jnp.sum(za_n * (zb32 * sb)) / n   # transformative invariance
    za_mm = za_n.astype(mm_dtype)                        # kernel input (normalized)
    c_old = C_old.astype(jnp.float32)

    # ---- tiling / VMEM budget from the actual chip --------------------------
    try:
        vmem_cap = int(pltpu.get_tpu_info().vmem_capacity_bytes)
    except Exception:
        vmem_cap = 64 * 2**20       # conservative fallback (v7x per-core VMEM)

    if tile is None:
        # large C tiles amortize the ~0.35 µs per-grid-step overhead; back off
        # for f32 operands on small-VMEM chips (v7x: 64 MiB).
        pref = 1024 if (use_bf16_matmul or vmem_cap >= 96 * 2**20) else 768
    else:
        pref = int(tile)
    td = _pick_tile(d, pref)
    n_blk = d // td

    mm_size = jnp.dtype(mm_dtype).itemsize
    est = (2 * n * d * mm_size          # resident normalized z_a (2 pipeline bufs)
           + 5 * td * td * 4            # C_old in (<=3 bufs) + C_new out (2 bufs)
           + 3 * td * td * 4)           # b_tile / c_new / product temporaries
    vmem_limit = int(min(int(0.85 * vmem_cap), max(2 * est, 32 * 2**20)))

    # ---- BlockSpecs ----------------------------------------------------------
    c_in_spec = pl.BlockSpec((td, td), lambda i, j: (i, j))
    if n_blk >= 3:
        try:
            # triple-buffer the C_old stream: it is the critical HBM path in
            # the (common) memory-bound regime.
            c_in_spec = pl.BlockSpec((td, td), lambda i, j: (i, j),
                                     pipeline_mode=pl.Buffered(3))
        except TypeError:
            pass  # older jax without pipeline_mode: keep default double-buffer

    kernel = functools.partial(_tico_kernel, beta=float(beta),
                               inv_n=1.0 / n, td=td)

    cost = pl.CostEstimate(
        flops=2 * n * d * d + 4 * d * d,
        transcendentals=0,
        bytes_accessed=n * d * mm_size + 2 * d * d * 4 + 4 * n_blk)

    c_new, lpart = pl.pallas_call(
        kernel,
        out_shape=(
            jax.ShapeDtypeStruct((d, d), jnp.float32),       # C_new
            jax.ShapeDtypeStruct((n_blk, 1), jnp.float32),   # per-row loss partials
        ),
        grid=(n_blk, n_blk),
        in_specs=[
            pl.BlockSpec((n, d), lambda i, j: (0, 0)),       # normalized z_a (resident)
            c_in_spec,                                       # C_old tile
        ],
        out_specs=(
            pl.BlockSpec((td, td), lambda i, j: (i, j)),     # C_new tile
            pl.BlockSpec((1, 1), lambda i, j: (i, 0),
                         memory_space=pltpu.MemorySpace.SMEM),
        ),
        compiler_params=pltpu.CompilerParams(
            # i row-blocks are fully independent (their own C_new rows and
            # their own SMEM loss partial) -> megacore-safe "parallel";
            # the j axis carries the per-i accumulation -> "arbitrary".
            dimension_semantics=("parallel", "arbitrary"),
            vmem_limit_bytes=vmem_limit,
        ),
        cost_estimate=cost,
    )(za_mm, c_old)

    loss = invariance + rho * jnp.sum(lpart)
    return loss, c_new


class TiCoLossJAX:
    """Functional-state mirror of the PyTorch TiCoLoss module.

    gather_distributed is not supported here (single-device kernel).
    """

    def __init__(self, beta: float = 0.9, rho: float = 8.0):
        self.beta = float(beta)
        self.rho = float(rho)
        self.C = None  # EMA covariance, lazily initialized to zeros

    def __call__(self, z_a, z_b, update_covariance_matrix: bool = True):
        d = z_a.shape[1]
        if self.C is None:
            self.C = jnp.zeros((d, d), dtype=jnp.float32)
        loss, c_new = tico_loss_pallas(z_a, z_b, self.C,
                                       beta=self.beta, rho=self.rho)
        if update_covariance_matrix:
            self.C = c_new
        return loss


def _reference(z_a, z_b, C_old, beta, rho):
    """Pure-JAX mirror of the PyTorch module (two-matmul formulation)."""
    za = z_a / jnp.maximum(jnp.linalg.norm(z_a, axis=1, keepdims=True), 1e-12)
    zb = z_b / jnp.maximum(jnp.linalg.norm(z_b, axis=1, keepdims=True), 1e-12)
    B = (za.T @ za) / za.shape[0]
    C = beta * C_old + (1 - beta) * B
    inv = 1.0 - jnp.mean(jnp.sum(za * zb, axis=1))
    cov = rho * jnp.mean(jnp.sum((za @ C) * za, axis=1))
    return inv + cov, C


if __name__ == "__main__":
    # Small shapes consistent with the module: [batch, num_features=256]
    N, D = 8, 256
    key = jax.random.PRNGKey(0)
    ka, kb, kc, kd = jax.random.split(key, 4)
    z_a = jax.random.normal(ka, (N, D), dtype=jnp.float32)
    z_b = jax.random.normal(kb, (N, D), dtype=jnp.float32)

    loss_fn = TiCoLossJAX(beta=0.9, rho=8.0)
    loss1 = loss_fn(z_a, z_b)
    jax.block_until_ready(loss1)
    jax.block_until_ready(loss_fn.C)

    # second step exercises the EMA path with a non-zero covariance state
    z_a2 = jax.random.normal(kc, (N, D), dtype=jnp.float32)
    z_b2 = jax.random.normal(kd, (N, D), dtype=jnp.float32)
    loss2 = loss_fn(z_a2, z_b2)
    jax.block_until_ready(loss2)
    jax.block_until_ready(loss_fn.C)

    # Sanity check against the pure-JAX / PyTorch-equivalent reference.
    # Tolerances leave room for XLA-vs-Mosaic default f32 matmul precision
    # differences on TPU (both may round MXU operands to bf16).
    ref_loss1, ref_C1 = _reference(z_a, z_b, jnp.zeros((D, D), jnp.float32), 0.9, 8.0)
    ref_loss2, ref_C2 = _reference(z_a2, z_b2, ref_C1, 0.9, 8.0)
    assert jnp.allclose(loss1, ref_loss1, atol=2e-3, rtol=2e-3), (loss1, ref_loss1)
    assert jnp.allclose(loss2, ref_loss2, atol=2e-3, rtol=2e-3), (loss2, ref_loss2)
    assert jnp.allclose(loss_fn.C, ref_C2, atol=5e-5, rtol=5e-3), "covariance mismatch"

    print("KERNEL_OK")
</pallas_src>

<mosaic_0001>
module attributes {stable_mosaic.version = 11 : i64} {
  func.func @_tico_kernel(%arg0: i32, %arg1: i32, %arg2: memref<8x256xf32, #tpu.memory_space<vmem>>, %arg3: memref<256x256xf32, #tpu.memory_space<vmem>>, %arg4: memref<256x256xf32, #tpu.memory_space<vmem>>, %arg5: memref<1x1xf32, #tpu.memory_space<smem>>) attributes {dimension_semantics = [#tpu.dimension_semantics<parallel>, #tpu.dimension_semantics<arbitrary>], iteration_bounds = array<i64: 1, 1>, scalar_prefetch = 0 : i64, scratch_operands = 0 : i64, tpu.core_type = #tpu.core_type<tc>, window_params = [{pipeline_mode = #tpu.pipeline_mode<synchronous>, transform_indices = @transform_0, window_bounds = array<i64: 8, 256>}, {transform_indices = @transform_1, window_bounds = array<i64: 256, 256>}, {transform_indices = @transform_2, window_bounds = array<i64: 256, 256>}, {transform_indices = @transform_3, window_bounds = array<i64: 1, 1>}]} {
    %c0 = arith.constant 0 : index
    %c0_0 = arith.constant 0 : index
    %0 = vector.load %arg2[%c0, %c0_0] : memref<8x256xf32, #tpu.memory_space<vmem>>, vector<8x256xf32>
    %cst = arith.constant dense<0.000000e+00> : vector<256x256xf32>
    %1 = tpu.matmul %0, %0, %cst {dimension_numbers = #tpu.dot_dimension_numbers<[0], [0], [1], [1], [0, 1, 1, 1], [], []>} : vector<8x256xf32>, vector<8x256xf32>, vector<256x256xf32> -> vector<256x256xf32>
    %cst_1 = arith.constant 1.250000e-01 : f32
    %2 = vector.broadcast %cst_1 : f32 to vector<256x256xf32>
    %3 = arith.mulf %1, %2 : vector<256x256xf32>
    %c0_2 = arith.constant 0 : index
    %c0_3 = arith.constant 0 : index
    %4 = vector.load %arg3[%c0_2, %c0_3] : memref<256x256xf32, #tpu.memory_space<vmem>>, vector<256x256xf32>
    %cst_4 = arith.constant 0.899999976 : f32
    %5 = vector.broadcast %cst_4 : f32 to vector<256x256xf32>
    %6 = arith.mulf %5, %4 : vector<256x256xf32>
    %cst_5 = arith.constant 1.000000e-01 : f32
    %7 = vector.broadcast %cst_5 : f32 to vector<256x256xf32>
    %8 = arith.mulf %7, %3 : vector<256x256xf32>
    %9 = arith.addf %6, %8 : vector<256x256xf32>
    %c0_6 = arith.constant 0 : index
    %c0_7 = arith.constant 0 : index
    %10 = vector.load %arg4[%c0_6, %c0_7] : memref<256x256xf32, #tpu.memory_space<vmem>>, vector<256x256xf32>
    tpu.vector_store %arg4[%c0_6, %c0_7], %9 {strides = array<i32>} : memref<256x256xf32, #tpu.memory_space<vmem>>, vector<256x256xf32>,
    %c0_i32 = arith.constant 0 : i32
    %11 = arith.cmpi eq, %arg1, %c0_i32 : i32
    %12 = arith.extui %11 : i1 to i32
    %c0_i32_8 = arith.constant 0 : i32
    %13 = arith.cmpi ne, %12, %c0_i32_8 : i32
    scf.if %13 {
      %cst_14 = arith.constant 0.000000e+00 : f32
      %c0_15 = arith.constant 0 : index
      %c0_16 = arith.constant 0 : index
      %22 = memref.load %arg5[%c0_15, %c0_16] : memref<1x1xf32, #tpu.memory_space<smem>>
      memref.store %cst_14, %arg5[%c0_15, %c0_16] : memref<1x1xf32, #tpu.memory_space<smem>>
    } else {
    }
    %c0_9 = arith.constant 0 : index
    %c0_10 = arith.constant 0 : index
    %14 = memref.load %arg5[%c0_9, %c0_10] : memref<1x1xf32, #tpu.memory_space<smem>>
    %15 = arith.mulf %3, %9 : vector<256x256xf32>
    %16 = vector.shape_cast %15 : vector<256x256xf32> to vector<1x256x256xf32>
    %cst_11 = arith.constant dense<0.000000e+00> : vector<1xf32>
    %17 = vector.multi_reduction <add>, %16, %cst_11 [1, 2] : vector<1x256x256xf32> to vector<1xf32>
    %18 = vector.shape_cast %17 : vector<1xf32> to vector<1x1x1xf32>
    %19 = vector.extract %18[0, 0, 0] : f32 from vector<1x1x1xf32>
    %20 = arith.addf %14, %19 : f32
    %c0_12 = arith.constant 0 : index
    %c0_13 = arith.constant 0 : index
    %21 = memref.load %arg5[%c0_12, %c0_13] : memref<1x1xf32, #tpu.memory_space<smem>>
    memref.store %20, %arg5[%c0_12, %c0_13] : memref<1x1xf32, #tpu.memory_space<smem>>
    return
  }
  func.func @transform_0(%arg0: i32, %arg1: i32) -> (i32, i32) {
    %c0_i32 = arith.constant 0 : i32
    %c0_i32_0 = arith.constant 0 : i32
    %c0_i32_1 = arith.constant 0 : i32
    return %c0_i32, %c0_i32_0 : i32, i32
  }
  func.func @transform_1(%arg0: i32, %arg1: i32) -> (i32, i32) {
    %c0_i32 = arith.constant 0 : i32
    return %arg0, %arg1 : i32, i32
  }
  func.func @transform_2(%arg0: i32, %arg1: i32) -> (i32, i32) {
    %c0_i32 = arith.constant 0 : i32
    return %arg0, %arg1 : i32, i32
  }
  func.func @transform_3(%arg0: i32, %arg1: i32) -> (i32, i32) {
    %c0_i32 = arith.constant 0 : i32
    %c0_i32_0 = arith.constant 0 : i32
    return %arg0, %c0_i32 : i32, i32
  }
}

</mosaic_0001>

<bundles_post_ra>
// kernel: tico_loss_pallas.1
= control target key start
LH: loop header
LB: loop body
LE: loop exit
PB: predicated region body
PF: predicated region fallthrough
CT: control target
= control target key end

     0   :  { %9 = vsyncpa [#allocation3], 0  ;;  %s1267_s0 = inlined_call_operand.vmem [shape: f32[8,256], index: 0, kind: input, shape index: {}]   ;;  %s1268_s1 = inlined_call_operand.hbm [shape: f32[256,256], index: 1, kind: input, shape index: {}]   ;;  %s1269_s2 = inlined_call_operand.hbm [shape: f32[256,256], index: 2, kind: output, shape index: {0}]   ;;  %s1270_s3 = inlined_call_operand.hbm [shape: f32[1,1], index: 3, kind: output, shape index: {1}]  }
   0x1   :  { %10 = vsyncpa [#allocation4], 0 }
   0x2   :  { %11 = vsyncpa [#allocation5], 0  ;;  %s18_s14 = sshll.u32 %s1268_s1, 4  ;;  %s1125_s15 = smov [#allocation2]   ;;  %s19_s14 = int_to_ptr.hbm [resolvable:$true] %s18_s14 }
   0x3   :  { %s20_s16 = sshll.u32 %s1125_s15, 4  ;;  %s1126_s17 = smov 256   ;;  %s21_s16 = int_to_ptr.vmem [resolvable:$true] %s20_s16 }
   0x4   :  { %s1127_s18 = smov 16  }
   0x5   :  { %26 = dma.hbm_to_vmem [thread:$0]  %s19_s14, 8192, %s21_s16, [#allocation3], %s1126_s17, %s1126_s17, %s1127_s18  }
   0x6   :  { %1119 = dma.done.wait [#allocation3], 8192  }
   0x7   :  { %1120 = vsyncadd [#allocation3], 4294959104  ;;  %v31_v0 = vld [vmem:[%s1267_s0] sm:$0xff]  ;;  %v32_v1 = vld [vmem:[%s1267_s0 + $0x8] sm:$0xff]  ;;  %vm97_vm0 = vcmask 64512   ;;  %s956_s23 = sshll.u32 %s1269_s2, 4  ;;  %s957_s23 = int_to_ptr.hbm [resolvable:$true] %s956_s23 }
   0x8   :  { %33 = vxpose.xlu0.b32.start.end [1/1] (short) %v31_v0, 128  ;;  %322 = vmatpush.msra.mxu1 %v32_v1  ;;  %v484_v18 = vld [vmem:[#allocation2] sm:$0xff]  ;;  %v485_v19 = vld [vmem:[#allocation2 + $0x8] sm:$0xff]  ;;  %v486_v31 = vld [vmem:[#allocation2 + $0x10] sm:$0xff]  ;;  %s1128_s24 = smov [#allocation6]   ;;  %s968_s2 = sshll.u32 %s1270_s3, 4  ;;  %s969_s2 = int_to_ptr.hbm [resolvable:$true] %s968_s2 }
   0x9   :  { %209 = vmatpush.msra.mxu0 %v31_v0  ;;  %1049 = vmatpush.msra.mxu3 %v32_v1  ;;  %v548_v23 = vmul.f32 0.9, %v484_v18  ;;  %v549_v25 = vmul.f32 0.9, %v485_v19  ;;  %v487_v32 = vld [vmem:[#allocation2 + $0x18] sm:$0xff]  ;;  %v488_v47 = vld [vmem:[#allocation2 + $0x20] sm:$0xff] }
   0xa   :  { %1048 = vmatpush.msra.mxu2 %v31_v0  ;;  %v550_v36 = vmul.f32 0.9, %v486_v31  ;;  %v551_v41 = vmul.f32 0.9, %v487_v32  ;;  %v489_v48 = vld [vmem:[#allocation2 + $0x28] sm:$0xff]  ;;  %v490_v0 = vld [vmem:[#allocation2 + $0x30] sm:$0xff] }
   0xb   :  { %v552_v52 = vmul.f32 0.9, %v488_v47  ;;  %v553_v57 = vmul.f32 0.9, %v489_v48  ;;  %v493_v18 = vld [vmem:[#allocation2 + $0x48] sm:$0xff]  ;;  %s954_s25 = sshll.u32 %s1128_s24, 4  ;;  %s955_s25 = int_to_ptr.vmem [resolvable:$true] %s954_s25 }
   0xc   :  { %s1129_s29 = smov [#allocation7]  }
  0x88   :  { %65 = vxpose.xlu0.b32.start.end [1/1] (short) %v32_v1, 128  ;;  %v491_v1 = vld [vmem:[#allocation2 + $0x38] sm:$0xff] }
  0xac   :  { %v49_v2 = vpop.trf.xlu0 }
  0xad   :  { %984 = vmatmul.msk.f32.vlgmr.msra.gmra.mxu0 %vm97_vm0, %v49_v2  ;;  %1016 = vmatmul.msk.f32.vlgmr.msra.gmra.mxu1 %vm97_vm0, %v49_v2 }
  0xb4   :  { %v50_v3 = vpop.trf.xlu0 }
  0xb5   :  { %985 = vmatmul.msk.f32.gmra.mxu0 %vm97_vm0, %v50_v3  ;;  %1017 = vmatmul.msk.f32.gmra.mxu1 %vm97_vm0, %v50_v3 }
  0xbc   :  { %v51_v4 = vpop.trf.xlu0 }
  0xbd   :  { %986 = vmatmul.msk.f32.gmra.mxu0 %vm97_vm0, %v51_v4  ;;  %1018 = vmatmul.msk.f32.gmra.mxu1 %vm97_vm0, %v51_v4 }
  0xc4   :  { %v52_v5 = vpop.trf.xlu0 }
  0xc5   :  { %987 = vmatmul.msk.f32.gmra.mxu0 %vm97_vm0, %v52_v5  ;;  %1019 = vmatmul.msk.f32.gmra.mxu1 %vm97_vm0, %v52_v5  ;;  %v554_v5 = vmul.f32 0.9, %v490_v0 }
  0xcc   :  { %v53_v6 = vpop.trf.xlu0 }
  0xcd   :  { %988 = vmatmul.msk.f32.gmra.mxu0 %vm97_vm0, %v53_v6  ;;  %1020 = vmatmul.msk.f32.gmra.mxu1 %vm97_vm0, %v53_v6 }
  0xd4   :  { %v54_v7 = vpop.trf.xlu0 }
  0xd5   :  { %989 = vmatmul.msk.f32.gmra.mxu0 %vm97_vm0, %v54_v7  ;;  %1021 = vmatmul.msk.f32.gmra.mxu1 %vm97_vm0, %v54_v7 }
  0xdc   :  { %v55_v8 = vpop.trf.xlu0 }
  0xdd   :  { %990 = vmatmul.msk.f32.gmra.mxu0 %vm97_vm0, %v55_v8  ;;  %1022 = vmatmul.msk.f32.gmra.mxu1 %vm97_vm0, %v55_v8 }
  0xe4   :  { %v56_v9 = vpop.trf.xlu0 }
  0xe5   :  { %991 = vmatmul.msk.f32.gmra.mxu0 %vm97_vm0, %v56_v9  ;;  %1023 = vmatmul.msk.f32.gmra.mxu1 %vm97_vm0, %v56_v9 }
  0xec   :  { %v57_v10 = vpop.trf.xlu0 }
  0xed   :  { %992 = vmatmul.msk.f32.gmra.mxu0 %vm97_vm0, %v57_v10  ;;  %1024 = vmatmul.msk.f32.gmra.mxu1 %vm97_vm0, %v57_v10  ;;  %v555_v10 = vmul.f32 0.9, %v491_v1 }
  0xf4   :  { %v58_v11 = vpop.trf.xlu0 }
  0xf5   :  { %993 = vmatmul.msk.f32.gmra.mxu0 %vm97_vm0, %v58_v11  ;;  %1025 = vmatmul.msk.f32.gmra.mxu1 %vm97_vm0, %v58_v11 }
  0xfc   :  { %v59_v12 = vpop.trf.xlu0 }
  0xfd   :  { %994 = vmatmul.msk.f32.gmra.mxu0 %vm97_vm0, %v59_v12  ;;  %1026 = vmatmul.msk.f32.gmra.mxu1 %vm97_vm0, %v59_v12 }
 0x104   :  { %v60_v13 = vpop.trf.xlu0 }
 0x105   :  { %995 = vmatmul.msk.f32.gmra.mxu0 %vm97_vm0, %v60_v13  ;;  %1027 = vmatmul.msk.f32.gmra.mxu1 %vm97_vm0, %v60_v13 }
 0x10c   :  { %v61_v14 = vpop.trf.xlu0 }
 0x10d   :  { %996 = vmatmul.msk.f32.gmra.mxu0 %vm97_vm0, %v61_v14  ;;  %1028 = vmatmul.msk.f32.gmra.mxu1 %vm97_vm0, %v61_v14 }
 0x114   :  { %v62_v15 = vpop.trf.xlu0 }
 0x115   :  { %997 = vmatmul.msk.f32.gmra.mxu0 %vm97_vm0, %v62_v15  ;;  %1029 = vmatmul.msk.f32.gmra.mxu1 %vm97_vm0, %v62_v15 }
 0x11c   :  { %v63_v16 = vpop.trf.xlu0 }
 0x11d   :  { %998 = vmatmul.msk.f32.gmra.mxu0 %vm97_vm0, %v63_v16  ;;  %1030 = vmatmul.msk.f32.gmra.mxu1 %vm97_vm0, %v63_v16 }
 0x124   :  { %v64_v17 = vpop.trf.xlu0 }
 0x125   :  { %999 = vmatmul.msk.f32.gmra.mxu0 %vm97_vm0, %v64_v17  ;;  %1031 = vmatmul.msk.f32.gmra.mxu1 %vm97_vm0, %v64_v17  ;;  %v492_v17 = vld [vmem:[#allocation2 + $0x40] sm:$0xff] }
 0x12a   :  { %v211_v20 = vpop.f32.mrf.mxu0  ;;  %v324_v21 = vpop.f32.mrf.mxu1 }
 0x12b   :  { %v420_v22 = vmul.f32 0.125, %v211_v20  ;;  %v421_v24 = vmul.f32 0.125, %v324_v21 }
 0x12c   :  { %v81_v26 = vpop.trf.xlu0 }
 0x12d   :  { %v612_v27 = vmul.f32 0.1, %v420_v22  ;;  %v613_v28 = vmul.f32 0.1, %v421_v24  ;;  %1000 = vmatmul.msk.f32.vlgmr.msra.gmra.mxu2 %vm97_vm0, %v81_v26  ;;  %1032 = vmatmul.msk.f32.vlgmr.msra.gmra.mxu3 %vm97_vm0, %v81_v26 }
 0x12f   :  { %v676_v29 = vadd.f32 %v612_v27, %v548_v23  ;;  %v677_v30 = vadd.f32 %v613_v28, %v549_v25  ;;  %v557_v27 = vmul.f32 0.9, %v493_v18 }
 0x131   :  { %740 = vst [vmem:[#allocation6] sm:$0xff] %v676_v29  ;;  %v811_v33 = vmul.f32 %v676_v29, %v420_v22  ;;  %v812_v34 = vmul.f32 %v677_v30, %v421_v24  ;;  %v556_v22 = vmul.f32 0.9, %v492_v17 }
 0x132   :  { %741 = vst [vmem:[#allocation6 + $0x8] sm:$0xff] %v677_v30  ;;  %v214_v35 = vpop.f32.mrf.mxu0  ;;  %v327_v37 = vpop.f32.mrf.mxu1 }
 0x133   :  { %v875_v38 = vadd.f32 %v812_v34, %v811_v33  ;;  %v422_v39 = vmul.f32 0.125, %v214_v35  ;;  %v423_v40 = vmul.f32 0.125, %v327_v37  ;;  %v494_v34 = vld [vmem:[#allocation2 + $0x50] sm:$0xff]  ;;  %v495_v35 = vld [vmem:[#allocation2 + $0x58] sm:$0xff] }
 0x134   :  { %v82_v42 = vpop.trf.xlu0 }
 0x135   :  { %v614_v43 = vmul.f32 0.1, %v422_v39  ;;  %v615_v44 = vmul.f32 0.1, %v423_v40  ;;  %1001 = vmatmul.msk.f32.gmra.mxu2 %vm97_vm0, %v82_v42  ;;  %1033 = vmatmul.msk.f32.gmra.mxu3 %vm97_vm0, %v82_v42 }
 0x137   :  { %v678_v45 = vadd.f32 %v614_v43, %v550_v36  ;;  %v679_v46 = vadd.f32 %v615_v44, %v551_v41  ;;  %v559_v44 = vmul.f32 0.9, %v495_v35 }
 0x139   :  { %742 = vst [vmem:[#allocation6 + $0x10] sm:$0xff] %v678_v45  ;;  %v813_v49 = vmul.f32 %v678_v45, %v422_v39  ;;  %v814_v50 = vmul.f32 %v679_v46, %v423_v40  ;;  %v558_v39 = vmul.f32 0.9, %v494_v34 }
 0x13a   :  { %743 = vst [vmem:[#allocation6 + $0x18] sm:$0xff] %v679_v46  ;;  %v217_v51 = vpop.f32.mrf.mxu0  ;;  %v330_v53 = vpop.f32.mrf.mxu1 }
 0x13b   :  { %v876_v54 = vadd.f32 %v875_v38, %v813_v49  ;;  %v424_v55 = vmul.f32 0.125, %v217_v51  ;;  %v425_v56 = vmul.f32 0.125, %v330_v53  ;;  %v496_v51 = vld [vmem:[#allocation2 + $0x60] sm:$0xff] }
 0x13c   :  { %v83_v58 = vpop.trf.xlu0 }
 0x13d   :  { %v877_v59 = vadd.f32 %v876_v54, %v814_v50  ;;  %v616_v60 = vmul.f32 0.1, %v424_v55  ;;  %v617_v61 = vmul.f32 0.1, %v425_v56  ;;  %1002 = vmatmul.msk.f32.gmra.mxu2 %vm97_vm0, %v83_v58  ;;  %1034 = vmatmul.msk.f32.gmra.mxu3 %vm97_vm0, %v83_v58 }
 0x13f   :  { %v680_v62 = vadd.f32 %v616_v60, %v552_v52  ;;  %v681_v63 = vadd.f32 %v617_v61, %v553_v57  ;;  %v497_v52 = vld [vmem:[#allocation2 + $0x68] sm:$0xff] }
 0x140   :  { %v561_v61 = vmul.f32 0.9, %v497_v52 }
 0x141   :  { %744 = vst [vmem:[#allocation6 + $0x20] sm:$0xff] %v680_v62  ;;  %v815_v2 = vmul.f32 %v680_v62, %v424_v55  ;;  %v816_v3 = vmul.f32 %v681_v63, %v425_v56  ;;  %v560_v56 = vmul.f32 0.9, %v496_v51 }
 0x142   :  { %745 = vst [vmem:[#allocation6 + $0x28] sm:$0xff] %v681_v63  ;;  %v220_v4 = vpop.f32.mrf.mxu0  ;;  %v333_v6 = vpop.f32.mrf.mxu1 }
 0x143   :  { %v878_v7 = vadd.f32 %v877_v59, %v815_v2  ;;  %v426_v8 = vmul.f32 0.125, %v220_v4  ;;  %v427_v9 = vmul.f32 0.125, %v333_v6  ;;  %v498_v4 = vld [vmem:[#allocation2 + $0x70] sm:$0xff] }
 0x144   :  { %v84_v11 = vpop.trf.xlu0 }
 0x145   :  { %v879_v12 = vadd.f32 %v878_v7, %v816_v3  ;;  %v618_v13 = vmul.f32 0.1, %v426_v8  ;;  %v619_v14 = vmul.f32 0.1, %v427_v9  ;;  %1003 = vmatmul.msk.f32.gmra.mxu2 %vm97_vm0, %v84_v11  ;;  %1035 = vmatmul.msk.f32.gmra.mxu3 %vm97_vm0, %v84_v11 }
 0x147   :  { %v682_v15 = vadd.f32 %v618_v13, %v554_v5  ;;  %v683_v16 = vadd.f32 %v619_v14, %v555_v10  ;;  %v499_v5 = vld [vmem:[#allocation2 + $0x78] sm:$0xff] }
 0x148   :  { %v563_v14 = vmul.f32 0.9, %v499_v5 }
 0x149   :  { %746 = vst [vmem:[#allocation6 + $0x30] sm:$0xff] %v682_v15  ;;  %v817_v19 = vmul.f32 %v682_v15, %v426_v8  ;;  %v818_v20 = vmul.f32 %v683_v16, %v427_v9  ;;  %v562_v9 = vmul.f32 0.9, %v498_v4 }
 0x14a   :  { %747 = vst [vmem:[#allocation6 + $0x38] sm:$0xff] %v683_v16  ;;  %v223_v21 = vpop.f32.mrf.mxu0  ;;  %v336_v23 = vpop.f32.mrf.mxu1 }
 0x14b   :  { %v880_v24 = vadd.f32 %v879_v12, %v817_v19  ;;  %v428_v25 = vmul.f32 0.125, %v223_v21  ;;  %v429_v26 = vmul.f32 0.125, %v336_v23  ;;  %v500_v21 = vld [vmem:[#allocation2 + $0x80] sm:$0xff] }
 0x14c   :  { %v85_v28 = vpop.trf.xlu0 }
 0x14d   :  { %v881_v29 = vadd.f32 %v880_v24, %v818_v20  ;;  %v620_v30 = vmul.f32 0.1, %v428_v25  ;;  %v621_v31 = vmul.f32 0.1, %v429_v26  ;;  %1004 = vmatmul.msk.f32.gmra.mxu2 %vm97_vm0, %v85_v28  ;;  %1036 = vmatmul.msk.f32.gmra.mxu3 %vm97_vm0, %v85_v28 }
 0x14f   :  { %v684_v32 = vadd.f32 %v620_v30, %v556_v22  ;;  %v685_v33 = vadd.f32 %v621_v31, %v557_v27  ;;  %v501_v22 = vld [vmem:[#allocation2 + $0x88] sm:$0xff] }
 0x150   :  { %v565_v31 = vmul.f32 0.9, %v501_v22 }
 0x151   :  { %748 = vst [vmem:[#allocation6 + $0x40] sm:$0xff] %v684_v32  ;;  %v819_v36 = vmul.f32 %v684_v32, %v428_v25  ;;  %v820_v37 = vmul.f32 %v685_v33, %v429_v26  ;;  %v564_v26 = vmul.f32 0.9, %v500_v21 }
 0x152   :  { %749 = vst [vmem:[#allocation6 + $0x48] sm:$0xff] %v685_v33  ;;  %v226_v38 = vpop.f32.mrf.mxu0  ;;  %v339_v40 = vpop.f32.mrf.mxu1 }
 0x153   :  { %v882_v41 = vadd.f32 %v881_v29, %v819_v36  ;;  %v430_v42 = vmul.f32 0.125, %v226_v38  ;;  %v431_v43 = vmul.f32 0.125, %v339_v40  ;;  %v502_v38 = vld [vmem:[#allocation2 + $0x90] sm:$0xff] }
 0x154   :  { %v86_v45 = vpop.trf.xlu0 }
 0x155   :  { %v883_v46 = vadd.f32 %v882_v41, %v820_v37  ;;  %v622_v47 = vmul.f32 0.1, %v430_v42  ;;  %v623_v48 = vmul.f32 0.1, %v431_v43  ;;  %1005 = vmatmul.msk.f32.gmra.mxu2 %vm97_vm0, %v86_v45  ;;  %1037 = vmatmul.msk.f32.gmra.mxu3 %vm97_vm0, %v86_v45 }
 0x157   :  { %v686_v49 = vadd.f32 %v622_v47, %v558_v39  ;;  %v687_v50 = vadd.f32 %v623_v48, %v559_v44  ;;  %v503_v39 = vld [vmem:[#allocation2 + $0x98] sm:$0xff] }
 0x158   :  { %v567_v48 = vmul.f32 0.9, %v503_v39 }
 0x159   :  { %750 = vst [vmem:[#allocation6 + $0x50] sm:$0xff] %v686_v49  ;;  %v821_v53 = vmul.f32 %v686_v49, %v430_v42  ;;  %v822_v54 = vmul.f32 %v687_v50, %v431_v43  ;;  %v566_v43 = vmul.f32 0.9, %v502_v38 }
 0x15a   :  { %751 = vst [vmem:[#allocation6 + $0x58] sm:$0xff] %v687_v50  ;;  %v229_v55 = vpop.f32.mrf.mxu0  ;;  %v342_v57 = vpop.f32.mrf.mxu1 }
 0x15b   :  { %v884_v58 = vadd.f32 %v883_v46, %v821_v53  ;;  %v432_v59 = vmul.f32 0.125, %v229_v55  ;;  %v433_v60 = vmul.f32 0.125, %v342_v57  ;;  %v504_v55 = vld [vmem:[#allocation2 + $0xa0] sm:$0xff] }
 0x15c   :  { %v87_v62 = vpop.trf.xlu0 }
 0x15d   :  { %v885_v63 = vadd.f32 %v884_v58, %v822_v54  ;;  %v624_v0 = vmul.f32 0.1, %v432_v59  ;;  %v625_v1 = vmul.f32 0.1, %v433_v60  ;;  %1006 = vmatmul.msk.f32.gmra.mxu2 %vm97_vm0, %v87_v62  ;;  %1038 = vmatmul.msk.f32.gmra.mxu3 %vm97_vm0, %v87_v62 }
 0x15f   :  { %v688_v2 = vadd.f32 %v624_v0, %v560_v56  ;;  %v689_v3 = vadd.f32 %v625_v1, %v561_v61  ;;  %v505_v56 = vld [vmem:[#allocation2 + $0xa8] sm:$0xff] }
 0x160   :  { %v569_v1 = vmul.f32 0.9, %v505_v56 }
 0x161   :  { %752 = vst [vmem:[#allocation6 + $0x60] sm:$0xff] %v688_v2  ;;  %v823_v6 = vmul.f32 %v688_v2, %v432_v59  ;;  %v824_v7 = vmul.f32 %v689_v3, %v433_v60  ;;  %v568_v60 = vmul.f32 0.9, %v504_v55 }
 0x162   :  { %753 = vst [vmem:[#allocation6 + $0x68] sm:$0xff] %v689_v3  ;;  %v232_v8 = vpop.f32.mrf.mxu0  ;;  %v345_v10 = vpop.f32.mrf.mxu1 }
 0x163   :  { %v886_v11 = vadd.f32 %v885_v63, %v823_v6  ;;  %v434_v12 = vmul.f32 0.125, %v232_v8  ;;  %v435_v13 = vmul.f32 0.125, %v345_v10  ;;  %v506_v8 = vld [vmem:[#allocation2 + $0xb0] sm:$0xff] }
 0x164   :  { %v88_v15 = vpop.trf.xlu0 }
 0x165   :  { %v887_v16 = vadd.f32 %v886_v11, %v824_v7  ;;  %v626_v17 = vmul.f32 0.1, %v434_v12  ;;  %v627_v18 = vmul.f32 0.1, %v435_v13  ;;  %1007 = vmatmul.msk.f32.gmra.mxu2 %vm97_vm0, %v88_v15  ;;  %1039 = vmatmul.msk.f32.gmra.mxu3 %vm97_vm0, %v88_v15 }
 0x167   :  { %v690_v19 = vadd.f32 %v626_v17, %v562_v9  ;;  %v691_v20 = vadd.f32 %v627_v18, %v563_v14  ;;  %v507_v9 = vld [vmem:[#allocation2 + $0xb8] sm:$0xff] }
 0x168   :  { %v571_v18 = vmul.f32 0.9, %v507_v9 }
 0x169   :  { %754 = vst [vmem:[#allocation6 + $0x70] sm:$0xff] %v690_v19  ;;  %v825_v23 = vmul.f32 %v690_v19, %v434_v12  ;;  %v826_v24 = vmul.f32 %v691_v20, %v435_v13  ;;  %v570_v13 = vmul.f32 0.9, %v506_v8 }
 0x16a   :  { %755 = vst [vmem:[#allocation6 + $0x78] sm:$0xff] %v691_v20  ;;  %v235_v25 = vpop.f32.mrf.mxu0  ;;  %v348_v27 = vpop.f32.mrf.mxu1 }
 0x16b   :  { %v888_v28 = vadd.f32 %v887_v16, %v825_v23  ;;  %v436_v29 = vmul.f32 0.125, %v235_v25  ;;  %v437_v30 = vmul.f32 0.125, %v348_v27  ;;  %v508_v25 = vld [vmem:[#allocation2 + $0xc0] sm:$0xff] }
 0x16c   :  { %v89_v32 = vpop.trf.xlu0 }
 0x16d   :  { %v889_v33 = vadd.f32 %v888_v28, %v826_v24  ;;  %v628_v34 = vmul.f32 0.1, %v436_v29  ;;  %v629_v35 = vmul.f32 0.1, %v437_v30  ;;  %1008 = vmatmul.msk.f32.gmra.mxu2 %vm97_vm0, %v89_v32  ;;  %1040 = vmatmul.msk.f32.gmra.mxu3 %vm97_vm0, %v89_v32 }
 0x16f   :  { %v692_v36 = vadd.f32 %v628_v34, %v564_v26  ;;  %v693_v37 = vadd.f32 %v629_v35, %v565_v31  ;;  %v509_v26 = vld [vmem:[#allocation2 + $0xc8] sm:$0xff] }
 0x170   :  { %v573_v35 = vmul.f32 0.9, %v509_v26 }
 0x171   :  { %756 = vst [vmem:[#allocation6 + $0x80] sm:$0xff] %v692_v36  ;;  %v827_v40 = vmul.f32 %v692_v36, %v436_v29  ;;  %v828_v41 = vmul.f32 %v693_v37, %v437_v30  ;;  %v572_v30 = vmul.f32 0.9, %v508_v25 }
 0x172   :  { %757 = vst [vmem:[#allocation6 + $0x88] sm:$0xff] %v693_v37  ;;  %v238_v42 = vpop.f32.mrf.mxu0  ;;  %v351_v44 = vpop.f32.mrf.mxu1 }
 0x173   :  { %v890_v45 = vadd.f32 %v889_v33, %v827_v40  ;;  %v438_v46 = vmul.f32 0.125, %v238_v42  ;;  %v439_v47 = vmul.f32 0.125, %v351_v44  ;;  %v510_v42 = vld [vmem:[#allocation2 + $0xd0] sm:$0xff] }
 0x174   :  { %v90_v49 = vpop.trf.xlu0 }
 0x175   :  { %v891_v50 = vadd.f32 %v890_v45, %v828_v41  ;;  %v630_v51 = vmul.f32 0.1, %v438_v46  ;;  %v631_v52 = vmul.f32 0.1, %v439_v47  ;;  %1009 = vmatmul.msk.f32.gmra.mxu2 %vm97_vm0, %v90_v49  ;;  %1041 = vmatmul.msk.f32.gmra.mxu3 %vm97_vm0, %v90_v49 }
 0x177   :  { %v694_v53 = vadd.f32 %v630_v51, %v566_v43  ;;  %v695_v54 = vadd.f32 %v631_v52, %v567_v48  ;;  %v511_v43 = vld [vmem:[#allocation2 + $0xd8] sm:$0xff] }
 0x178   :  { %v575_v52 = vmul.f32 0.9, %v511_v43 }
 0x179   :  { %758 = vst [vmem:[#allocation6 + $0x90] sm:$0xff] %v694_v53  ;;  %v829_v57 = vmul.f32 %v694_v53, %v438_v46  ;;  %v830_v58 = vmul.f32 %v695_v54, %v439_v47  ;;  %v574_v47 = vmul.f32 0.9, %v510_v42 }
 0x17a   :  { %759 = vst [vmem:[#allocation6 + $0x98] sm:$0xff] %v695_v54  ;;  %v241_v59 = vpop.f32.mrf.mxu0  ;;  %v354_v61 = vpop.f32.mrf.mxu1 }
 0x17b   :  { %v892_v62 = vadd.f32 %v891_v50, %v829_v57  ;;  %v440_v63 = vmul.f32 0.125, %v241_v59  ;;  %v441_v0 = vmul.f32 0.125, %v354_v61  ;;  %v512_v59 = vld [vmem:[#allocation2 + $0xe0] sm:$0xff] }
 0x17c   :  { %v91_v2 = vpop.trf.xlu0 }
 0x17d   :  { %v893_v3 = vadd.f32 %v892_v62, %v830_v58  ;;  %v632_v4 = vmul.f32 0.1, %v440_v63  ;;  %v633_v5 = vmul.f32 0.1, %v441_v0  ;;  %1010 = vmatmul.msk.f32.gmra.mxu2 %vm97_vm0, %v91_v2  ;;  %1042 = vmatmul.msk.f32.gmra.mxu3 %vm97_vm0, %v91_v2 }
 0x17f   :  { %v696_v6 = vadd.f32 %v632_v4, %v568_v60  ;;  %v697_v7 = vadd.f32 %v633_v5, %v569_v1  ;;  %v513_v60 = vld [vmem:[#allocation2 + $0xe8] sm:$0xff] }
 0x180   :  { %v577_v5 = vmul.f32 0.9, %v513_v60 }
 0x181   :  { %760 = vst [vmem:[#allocation6 + $0xa0] sm:$0xff] %v696_v6  ;;  %v831_v10 = vmul.f32 %v696_v6, %v440_v63  ;;  %v832_v11 = vmul.f32 %v697_v7, %v441_v0  ;;  %v576_v0 = vmul.f32 0.9, %v512_v59 }
 0x182   :  { %761 = vst [vmem:[#allocation6 + $0xa8] sm:$0xff] %v697_v7  ;;  %v244_v12 = vpop.f32.mrf.mxu0  ;;  %v357_v14 = vpop.f32.mrf.mxu1 }
 0x183   :  { %v894_v15 = vadd.f32 %v893_v3, %v831_v10  ;;  %v442_v16 = vmul.f32 0.125, %v244_v12  ;;  %v443_v17 = vmul.f32 0.125, %v357_v14  ;;  %v514_v12 = vld [vmem:[#allocation2 + $0xf0] sm:$0xff] }
 0x184   :  { %v92_v19 = vpop.trf.xlu0 }
 0x185   :  { %v895_v20 = vadd.f32 %v894_v15, %v832_v11  ;;  %v634_v21 = vmul.f32 0.1, %v442_v16  ;;  %v635_v22 = vmul.f32 0.1, %v443_v17  ;;  %1011 = vmatmul.msk.f32.gmra.mxu2 %vm97_vm0, %v92_v19  ;;  %1043 = vmatmul.msk.f32.gmra.mxu3 %vm97_vm0, %v92_v19 }
 0x187   :  { %v698_v23 = vadd.f32 %v634_v21, %v570_v13  ;;  %v699_v24 = vadd.f32 %v635_v22, %v571_v18  ;;  %v515_v13 = vld [vmem:[#allocation2 + $0xf8] sm:$0xff] }
 0x188   :  { %v579_v22 = vmul.f32 0.9, %v515_v13 }
 0x189   :  { %762 = vst [vmem:[#allocation6 + $0xb0] sm:$0xff] %v698_v23  ;;  %v833_v27 = vmul.f32 %v698_v23, %v442_v16  ;;  %v834_v28 = vmul.f32 %v699_v24, %v443_v17  ;;  %v578_v17 = vmul.f32 0.9, %v514_v12 }
 0x18a   :  { %763 = vst [vmem:[#allocation6 + $0xb8] sm:$0xff] %v699_v24  ;;  %v247_v29 = vpop.f32.mrf.mxu0  ;;  %v360_v31 = vpop.f32.mrf.mxu1 }
 0x18b   :  { %v896_v32 = vadd.f32 %v895_v20, %v833_v27  ;;  %v444_v33 = vmul.f32 0.125, %v247_v29  ;;  %v445_v34 = vmul.f32 0.125, %v360_v31 }
 0x18c   :  { %v93_v36 = vpop.trf.xlu0 }
 0x18d   :  { %v897_v37 = vadd.f32 %v896_v32, %v834_v28  ;;  %v636_v38 = vmul.f32 0.1, %v444_v33  ;;  %v637_v39 = vmul.f32 0.1, %v445_v34  ;;  %1012 = vmatmul.msk.f32.gmra.mxu2 %vm97_vm0, %v93_v36  ;;  %1044 = vmatmul.msk.f32.gmra.mxu3 %vm97_vm0, %v93_v36 }
 0x18f   :  { %v700_v40 = vadd.f32 %v636_v38, %v572_v30  ;;  %v701_v41 = vadd.f32 %v637_v39, %v573_v35 }
 0x191   :  { %764 = vst [vmem:[#allocation6 + $0xc0] sm:$0xff] %v700_v40  ;;  %v835_v44 = vmul.f32 %v700_v40, %v444_v33  ;;  %v836_v45 = vmul.f32 %v701_v41, %v445_v34  ;;  %v516_v33 = vld [vmem:[#allocation2 + $0x100] sm:$0xff]  ;;  %v517_v34 = vld [vmem:[#allocation2 + $0x108] sm:$0xff] }
 0x192   :  { %765 = vst [vmem:[#allocation6 + $0xc8] sm:$0xff] %v701_v41  ;;  %v250_v46 = vpop.f32.mrf.mxu0  ;;  %v363_v48 = vpop.f32.mrf.mxu1  ;;  %v580_v38 = vmul.f32 0.9, %v516_v33  ;;  %v581_v40 = vmul.f32 0.9, %v517_v34  ;;  %v526_v33 = vld [vmem:[#allocation2 + $0x150] sm:$0xff] }
 0x193   :  { %v898_v49 = vadd.f32 %v897_v37, %v835_v44  ;;  %v446_v50 = vmul.f32 0.125, %v250_v46  ;;  %v447_v51 = vmul.f32 0.125, %v363_v48  ;;  %v519_v46 = vld [vmem:[#allocation2 + $0x118] sm:$0xff] }
 0x194   :  { %v94_v53 = vpop.trf.xlu0  ;;  %v527_v34 = vld [vmem:[#allocation2 + $0x158] sm:$0xff] }
 0x195   :  { %v899_v54 = vadd.f32 %v898_v49, %v836_v45  ;;  %v638_v55 = vmul.f32 0.1, %v446_v50  ;;  %v639_v56 = vmul.f32 0.1, %v447_v51  ;;  %1013 = vmatmul.msk.f32.gmra.mxu2 %vm97_vm0, %v94_v53  ;;  %1045 = vmatmul.msk.f32.gmra.mxu3 %vm97_vm0, %v94_v53  ;;  %v518_v45 = vld [vmem:[#allocation2 + $0x110] sm:$0xff] }
 0x196   :  { %v582_v49 = vmul.f32 0.9, %v518_v45 }
 0x197   :  { %v702_v57 = vadd.f32 %v638_v55, %v574_v47  ;;  %v703_v58 = vadd.f32 %v639_v56, %v575_v52 }
 0x199   :  { %766 = vst [vmem:[#allocation6 + $0xd0] sm:$0xff] %v702_v57  ;;  %v837_v61 = vmul.f32 %v702_v57, %v446_v50  ;;  %v838_v62 = vmul.f32 %v703_v58, %v447_v51  ;;  %v583_v51 = vmul.f32 0.9, %v519_v46 }
 0x19a   :  { %767 = vst [vmem:[#allocation6 + $0xd8] sm:$0xff] %v703_v58  ;;  %v253_v63 = vpop.f32.mrf.mxu0  ;;  %v366_v1 = vpop.f32.mrf.mxu1 }
 0x19b   :  { %v900_v2 = vadd.f32 %v899_v54, %v837_v61  ;;  %v448_v3 = vmul.f32 0.125, %v253_v63  ;;  %v449_v4 = vmul.f32 0.125, %v366_v1  ;;  %v520_v61 = vld [vmem:[#allocation2 + $0x120] sm:$0xff] }
 0x19c   :  { %v95_v6 = vpop.trf.xlu0 }
 0x19d   :  { %v901_v7 = vadd.f32 %v900_v2, %v838_v62  ;;  %v640_v8 = vmul.f32 0.1, %v448_v3  ;;  %v641_v9 = vmul.f32 0.1, %v449_v4  ;;  %1014 = vmatmul.msk.f32.gmra.mxu2 %vm97_vm0, %v95_v6  ;;  %1046 = vmatmul.msk.f32.gmra.mxu3 %vm97_vm0, %v95_v6  ;;  %v521_v62 = vld [vmem:[#allocation2 + $0x128] sm:$0xff] }
 0x19e   :  { %v584_v2 = vmul.f32 0.9, %v520_v61 }
 0x19f   :  { %v704_v10 = vadd.f32 %v640_v8, %v576_v0  ;;  %v705_v11 = vadd.f32 %v641_v9, %v577_v5  ;;  %v522_v9 = vld [vmem:[#allocation2 + $0x130] sm:$0xff] }
 0x1a1   :  { %768 = vst [vmem:[#allocation6 + $0xe0] sm:$0xff] %v704_v10  ;;  %v839_v14 = vmul.f32 %v704_v10, %v448_v3  ;;  %v840_v15 = vmul.f32 %v705_v11, %v449_v4  ;;  %v585_v4 = vmul.f32 0.9, %v521_v62  ;;  %v523_v10 = vld [vmem:[#allocation2 + $0x138] sm:$0xff] }
 0x1a2   :  { %769 = vst [vmem:[#allocation6 + $0xe8] sm:$0xff] %v705_v11  ;;  %v256_v16 = vpop.f32.mrf.mxu0  ;;  %v369_v18 = vpop.f32.mrf.mxu1 }
 0x1a3   :  { %v902_v19 = vadd.f32 %v901_v7, %v839_v14  ;;  %v450_v20 = vmul.f32 0.125, %v256_v16  ;;  %v451_v21 = vmul.f32 0.125, %v369_v18  ;;  %v586_v14 = vmul.f32 0.9, %v522_v9 }
 0x1a4   :  { %v96_v23 = vpop.trf.xlu0  ;;  %v587_v16 = vmul.f32 0.9, %v523_v10 }
 0x1a5   :  { %v903_v24 = vadd.f32 %v902_v19, %v840_v15  ;;  %v642_v25 = vmul.f32 0.1, %v450_v20  ;;  %v643_v26 = vmul.f32 0.1, %v451_v21  ;;  %1015 = vmatmul.msk.f32.gmra.mxu2 %vm97_vm0, %v96_v23  ;;  %1047 = vmatmul.msk.f32.gmra.mxu3 %vm97_vm0, %v96_v23 }
 0x1a7   :  { %v706_v27 = vadd.f32 %v642_v25, %v578_v17  ;;  %v707_v28 = vadd.f32 %v643_v26, %v579_v22  ;;  %v525_v22 = vld [vmem:[#allocation2 + $0x148] sm:$0xff] }
 0x1a9   :  { %770 = vst [vmem:[#allocation6 + $0xf0] sm:$0xff] %v706_v27  ;;  %v841_v29 = vmul.f32 %v706_v27, %v450_v20  ;;  %v842_v30 = vmul.f32 %v707_v28, %v451_v21  ;;  %v524_v21 = vld [vmem:[#allocation2 + $0x140] sm:$0xff] }
 0x1aa   :  { %771 = vst [vmem:[#allocation6 + $0xf8] sm:$0xff] %v707_v28  ;;  %v588_v26 = vmul.f32 0.9, %v524_v21  ;;  %v589_v28 = vmul.f32 0.9, %v525_v22  ;;  %v533_v21 = vld [vmem:[#allocation2 + $0x188] sm:$0xff] }
 0x1ab   :  { %v904_v31 = vadd.f32 %v903_v24, %v841_v29 }
 0x1ad   :  { %v905_v32 = vadd.f32 %v904_v31, %v842_v30 }
 0x1b0   :  { %v259_v35 = vpop.f32.mrf.mxu2  ;;  %v372_v36 = vpop.f32.mrf.mxu3 }
 0x1b1   :  { %v452_v37 = vmul.f32 0.125, %v259_v35  ;;  %v453_v39 = vmul.f32 0.125, %v372_v36 }
 0x1b3   :  { %v644_v41 = vmul.f32 0.1, %v452_v37  ;;  %v645_v42 = vmul.f32 0.1, %v453_v39 }
 0x1b5   :  { %v708_v43 = vadd.f32 %v644_v41, %v580_v38  ;;  %v709_v44 = vadd.f32 %v645_v42, %v581_v40  ;;  %v591_v41 = vmul.f32 0.9, %v527_v34 }
 0x1b7   :  { %772 = vst [vmem:[#allocation6 + $0x100] sm:$0xff] %v708_v43  ;;  %v843_v47 = vmul.f32 %v708_v43, %v452_v37  ;;  %v844_v53 = vmul.f32 %v709_v44, %v453_v39  ;;  %v590_v39 = vmul.f32 0.9, %v526_v33 }
 0x1b8   :  { %773 = vst [vmem:[#allocation6 + $0x108] sm:$0xff] %v709_v44  ;;  %v262_v48 = vpop.f32.mrf.mxu2  ;;  %v375_v50 = vpop.f32.mrf.mxu3 }
 0x1b9   :  { %v906_v52 = vadd.f32 %v905_v32, %v843_v47  ;;  %v454_v54 = vmul.f32 0.125, %v262_v48  ;;  %v1226_v55 = vmul.f32 0.125, %v375_v50  ;;  %v528_v48 = vld [vmem:[#allocation2 + $0x160] sm:$0xff] }
 0x1bb   :  { %v907_v56 = vadd.f32 %v906_v52, %v844_v53  ;;  %v646_v57 = vmul.f32 0.1, %v454_v54  ;;  %v647_v58 = vmul.f32 0.1, %v1226_v55 }
 0x1bd   :  { %v710_v59 = vadd.f32 %v646_v57, %v582_v49  ;;  %v711_v60 = vadd.f32 %v647_v58, %v583_v51  ;;  %v529_v49 = vld [vmem:[#allocation2 + $0x168] sm:$0xff]  ;;  %v592_v57 = vmul.f32 0.9, %v528_v48 }
 0x1bf   :  { %774 = vst [vmem:[#allocation6 + $0x110] sm:$0xff] %v710_v59  ;;  %v845_v35 = vmul.f32 %v710_v59, %v454_v54  ;;  %v846_v47 = vmul.f32 %v711_v60, %v1226_v55  ;;  %v593_v59 = vmul.f32 0.9, %v529_v49 }
 0x1c0   :  { %775 = vst [vmem:[#allocation6 + $0x118] sm:$0xff] %v711_v60  ;;  %v265_v63 = vpop.f32.mrf.mxu2  ;;  %v378_v0 = vpop.f32.mrf.mxu3 }
 0x1c1   :  { %v456_v1 = vmul.f32 0.125, %v265_v63  ;;  %v1229_v3 = vmul.f32 0.125, %v378_v0  ;;  %v908_v44 = vadd.f32 %v907_v56, %v845_v35 }
 0x1c3   :  { %v648_v5 = vmul.f32 0.1, %v456_v1  ;;  %v649_v6 = vmul.f32 0.1, %v1229_v3  ;;  %v909_v51 = vadd.f32 %v908_v44, %v846_v47 }
 0x1c5   :  { %v712_v7 = vadd.f32 %v648_v5, %v584_v2  ;;  %v713_v8 = vadd.f32 %v649_v6, %v585_v4  ;;  %v531_v2 = vld [vmem:[#allocation2 + $0x178] sm:$0xff] }
 0x1c7   :  { %776 = vst [vmem:[#allocation6 + $0x120] sm:$0xff] %v712_v7  ;;  %v847_v50 = vmul.f32 %v712_v7, %v456_v1  ;;  %v848_v63 = vmul.f32 %v713_v8, %v1229_v3  ;;  %v530_v1 = vld [vmem:[#allocation2 + $0x170] sm:$0xff] }
 0x1c8   :  { %777 = vst [vmem:[#allocation6 + $0x128] sm:$0xff] %v713_v8  ;;  %v268_v11 = vpop.f32.mrf.mxu2  ;;  %v381_v12 = vpop.f32.mrf.mxu3  ;;  %v594_v6 = vmul.f32 0.9, %v530_v1 }
 0x1c9   :  { %v458_v13 = vmul.f32 0.125, %v268_v11  ;;  %v1232_v15 = vmul.f32 0.125, %v381_v12  ;;  %v910_v61 = vadd.f32 %v909_v51, %v847_v50  ;;  %v595_v12 = vmul.f32 0.9, %v531_v2 }
 0x1cb   :  { %v650_v17 = vmul.f32 0.1, %v458_v13  ;;  %v651_v18 = vmul.f32 0.1, %v1232_v15  ;;  %v911_v4 = vadd.f32 %v910_v61, %v848_v63 }
 0x1cd   :  { %v714_v19 = vadd.f32 %v650_v17, %v586_v14  ;;  %v1235_v20 = vadd.f32 %v651_v18, %v587_v16 }
 0x1cf   :  { %778 = vst [vmem:[#allocation6 + $0x130] sm:$0xff] %v714_v19  ;;  %v849_v55 = vmul.f32 %v714_v19, %v458_v13  ;;  %v850_v14 = vmul.f32 %v1235_v20, %v1232_v15  ;;  %v532_v19 = vld [vmem:[#allocation2 + $0x180] sm:$0xff] }
 0x1d0   :  { %779 = vst [vmem:[#allocation6 + $0x138] sm:$0xff] %v1235_v20  ;;  %v271_v23 = vpop.f32.mrf.mxu2  ;;  %v384_v24 = vpop.f32.mrf.mxu3 }
 0x1d1   :  { %v460_v25 = vmul.f32 0.125, %v271_v23  ;;  %v1238_v27 = vmul.f32 0.125, %v384_v24  ;;  %v912_v9 = vadd.f32 %v911_v4, %v849_v55  ;;  %v596_v24 = vmul.f32 0.9, %v532_v19 }
 0x1d3   :  { %v652_v29 = vmul.f32 0.1, %v460_v25  ;;  %v653_v30 = vmul.f32 0.1, %v1238_v27  ;;  %v913_v13 = vadd.f32 %v912_v9, %v850_v14  ;;  %v539_v9 = vld [vmem:[#allocation2 + $0x1b8] sm:$0xff] }
 0x1d5   :  { %v716_v31 = vadd.f32 %v652_v29, %v588_v26  ;;  %v1241_v32 = vadd.f32 %v653_v30, %v589_v28  ;;  %v597_v28 = vmul.f32 0.9, %v533_v21 }
 0x1d7   :  { %780 = vst [vmem:[#allocation6 + $0x140] sm:$0xff] %v716_v31  ;;  %v851_v16 = vmul.f32 %v716_v31, %v460_v25  ;;  %v852_v29 = vmul.f32 %v1241_v32, %v1238_v27 }
 0x1d8   :  { %781 = vst [vmem:[#allocation6 + $0x148] sm:$0xff] %v1241_v32  ;;  %v274_v36 = vpop.f32.mrf.mxu2  ;;  %v387_v37 = vpop.f32.mrf.mxu3 }
 0x1d9   :  { %v462_v38 = vmul.f32 0.125, %v274_v36  ;;  %v1244_v40 = vmul.f32 0.125, %v387_v37  ;;  %v914_v22 = vadd.f32 %v913_v13, %v851_v16  ;;  %v534_v37 = vld [vmem:[#allocation2 + $0x190] sm:$0xff] }
 0x1da   :  { %v598_v44 = vmul.f32 0.9, %v534_v37 }
 0x1db   :  { %v654_v42 = vmul.f32 0.1, %v462_v38  ;;  %v655_v43 = vmul.f32 0.1, %v1244_v40  ;;  %v915_v25 = vadd.f32 %v914_v22, %v852_v29 }
 0x1dd   :  { %v718_v45 = vadd.f32 %v654_v42, %v590_v39  ;;  %v719_v46 = vadd.f32 %v655_v43, %v591_v41  ;;  %v535_v39 = vld [vmem:[#allocation2 + $0x198] sm:$0xff] }
 0x1df   :  { %782 = vst [vmem:[#allocation6 + $0x150] sm:$0xff] %v718_v45  ;;  %v853_v30 = vmul.f32 %v718_v45, %v462_v38  ;;  %v854_v41 = vmul.f32 %v719_v46, %v1244_v40  ;;  %v599_v45 = vmul.f32 0.9, %v535_v39  ;;  %v537_v40 = vld [vmem:[#allocation2 + $0x1a8] sm:$0xff] }
 0x1e0   :  { %783 = vst [vmem:[#allocation6 + $0x158] sm:$0xff] %v719_v46  ;;  %v277_v52 = vpop.f32.mrf.mxu2  ;;  %v390_v53 = vpop.f32.mrf.mxu3 }
 0x1e1   :  { %v464_v54 = vmul.f32 0.125, %v277_v52  ;;  %v1248_v58 = vmul.f32 0.125, %v390_v53  ;;  %v916_v34 = vadd.f32 %v915_v25, %v853_v30 }
 0x1e3   :  { %v656_v62 = vmul.f32 0.1, %v464_v54  ;;  %v657_v56 = vmul.f32 0.1, %v1248_v58  ;;  %v917_v27 = vadd.f32 %v916_v34, %v854_v41 }
 0x1e5   :  { %v720_v60 = vadd.f32 %v656_v62, %v592_v57  ;;  %v721_v0 = vadd.f32 %v657_v56, %v593_v59  ;;  %v536_v59 = vld [vmem:[#allocation2 + $0x1a0] sm:$0xff] }
 0x1e6   :  { %v600_v61 = vmul.f32 0.9, %v536_v59 }
 0x1e7   :  { %784 = vst [vmem:[#allocation6 + $0x160] sm:$0xff] %v720_v60  ;;  %v855_v42 = vmul.f32 %v720_v60, %v464_v54  ;;  %v856_v51 = vmul.f32 %v721_v0, %v1248_v58  ;;  %v601_v60 = vmul.f32 0.9, %v537_v40 }
 0x1e8   :  { %785 = vst [vmem:[#allocation6 + $0x168] sm:$0xff] %v721_v0  ;;  %v280_v5 = vpop.f32.mrf.mxu2  ;;  %v393_v7 = vpop.f32.mrf.mxu3 }
 0x1e9   :  { %v466_v10 = vmul.f32 0.125, %v280_v5  ;;  %v467_v11 = vmul.f32 0.125, %v393_v7  ;;  %v918_v48 = vadd.f32 %v917_v27, %v855_v42  ;;  %v538_v7 = vld [vmem:[#allocation2 + $0x1b0] sm:$0xff]  ;;  %v543_v27 = vld [vmem:[#allocation2 + $0x1d8] sm:$0xff] }
 0x1ea   :  { %v602_v14 = vmul.f32 0.9, %v538_v7 }
 0x1eb   :  { %v658_v3 = vmul.f32 0.1, %v466_v10  ;;  %v659_v8 = vmul.f32 0.1, %v467_v11  ;;  %v919_v46 = vadd.f32 %v918_v48, %v856_v51 }
 0x1ed   :  { %v722_v17 = vadd.f32 %v658_v3, %v594_v6  ;;  %v723_v18 = vadd.f32 %v659_v8, %v595_v12  ;;  %v603_v3 = vmul.f32 0.9, %v539_v9 }
 0x1ef   :  { %786 = vst [vmem:[#allocation6 + $0x170] sm:$0xff] %v722_v17  ;;  %v857_v52 = vmul.f32 %v722_v17, %v466_v10  ;;  %v858_v1 = vmul.f32 %v723_v18, %v467_v11 }
 0x1f0   :  { %787 = vst [vmem:[#allocation6 + $0x178] sm:$0xff] %v723_v18  ;;  %v283_v23 = vpop.f32.mrf.mxu2  ;;  %v396_v26 = vpop.f32.mrf.mxu3 }
 0x1f1   :  { %v468_v15 = vmul.f32 0.125, %v283_v23  ;;  %v469_v20 = vmul.f32 0.125, %v396_v26  ;;  %v920_v56 = vadd.f32 %v919_v46, %v857_v52  ;;  %v540_v26 = vld [vmem:[#allocation2 + $0x1c0] sm:$0xff]  ;;  %v607_v52 = vmul.f32 0.9, %v543_v27 }
 0x1f2   :  { %v604_v25 = vmul.f32 0.9, %v540_v26 }
 0x1f3   :  { %v660_v31 = vmul.f32 0.1, %v468_v15  ;;  %v661_v33 = vmul.f32 0.1, %v469_v20  ;;  %v921_v58 = vadd.f32 %v920_v56, %v858_v1  ;;  %v545_v56 = vld [vmem:[#allocation2 + $0x1e8] sm:$0xff] }
 0x1f5   :  { %v724_v35 = vadd.f32 %v660_v31, %v596_v24  ;;  %v725_v36 = vadd.f32 %v661_v33, %v597_v28  ;;  %v541_v28 = vld [vmem:[#allocation2 + $0x1c8] sm:$0xff] }
 0x1f7   :  { %788 = vst [vmem:[#allocation6 + $0x180] sm:$0xff] %v724_v35  ;;  %v859_v2 = vmul.f32 %v724_v35, %v468_v15  ;;  %v860_v8 = vmul.f32 %v725_v36, %v469_v20  ;;  %v605_v35 = vmul.f32 0.9, %v541_v28 }
 0x1f8   :  { %789 = vst [vmem:[#allocation6 + $0x188] sm:$0xff] %v725_v36  ;;  %v286_v43 = vpop.f32.mrf.mxu2  ;;  %v399_v47 = vpop.f32.mrf.mxu3 }
 0x1f9   :  { %v470_v32 = vmul.f32 0.125, %v286_v43  ;;  %v471_v38 = vmul.f32 0.125, %v399_v47  ;;  %v922_v10 = vadd.f32 %v921_v58, %v859_v2  ;;  %v542_v47 = vld [vmem:[#allocation2 + $0x1d0] sm:$0xff]  ;;  %v609_v2 = vmul.f32 0.9, %v545_v56 }
 0x1fb   :  { %v662_v49 = vmul.f32 0.1, %v470_v32  ;;  %v663_v50 = vmul.f32 0.1, %v471_v38  ;;  %v923_v11 = vadd.f32 %v922_v10, %v860_v8 }
 0x1fd   :  { %v726_v53 = vadd.f32 %v662_v49, %v598_v44  ;;  %v727_v57 = vadd.f32 %v663_v50, %v599_v45  ;;  %v606_v45 = vmul.f32 0.9, %v542_v47 }
 0x1ff   :  { %790 = vst [vmem:[#allocation6 + $0x190] sm:$0xff] %v726_v53  ;;  %v861_v13 = vmul.f32 %v726_v53, %v470_v32  ;;  %v862_v29 = vmul.f32 %v727_v57, %v471_v38 }
 0x200   :  { %791 = vst [vmem:[#allocation6 + $0x198] sm:$0xff] %v727_v57  ;;  %v289_v54 = vpop.f32.mrf.mxu2  ;;  %v402_v62 = vpop.f32.mrf.mxu3 }
 0x201   :  { %v472_v63 = vmul.f32 0.125, %v289_v54  ;;  %v473_v55 = vmul.f32 0.125, %v402_v62  ;;  %v924_v22 = vadd.f32 %v923_v11, %v861_v13  ;;  %v544_v62 = vld [vmem:[#allocation2 + $0x1e0] sm:$0xff] }
 0x203   :  { %v664_v4 = vmul.f32 0.1, %v472_v63  ;;  %v665_v5 = vmul.f32 0.1, %v473_v55  ;;  %v925_v33 = vadd.f32 %v924_v22, %v862_v29 }
 0x205   :  { %v728_v0 = vadd.f32 %v664_v4, %v600_v61  ;;  %v729_v6 = vadd.f32 %v665_v5, %v601_v60  ;;  %v608_v60 = vmul.f32 0.9, %v544_v62 }
 0x207   :  { %792 = vst [vmem:[#allocation6 + $0x1a0] sm:$0xff] %v728_v0  ;;  %v863_v30 = vmul.f32 %v728_v0, %v472_v63  ;;  %v864_v41 = vmul.f32 %v729_v6, %v473_v55 }
 0x208   :  { %793 = vst [vmem:[#allocation6 + $0x1a8] sm:$0xff] %v729_v6  ;;  %v292_v12 = vpop.f32.mrf.mxu2  ;;  %v405_v16 = vpop.f32.mrf.mxu3 }
 0x209   :  { %v474_v17 = vmul.f32 0.125, %v292_v12  ;;  %v475_v19 = vmul.f32 0.125, %v405_v16  ;;  %v926_v36 = vadd.f32 %v925_v33, %v863_v30  ;;  %v546_v16 = vld [vmem:[#allocation2 + $0x1f0] sm:$0xff] }
 0x20b   :  { %v666_v18 = vmul.f32 0.1, %v474_v17  ;;  %v667_v21 = vmul.f32 0.1, %v475_v19  ;;  %v927_v32 = vadd.f32 %v926_v36, %v864_v41 }
 0x20d   :  { %v730_v23 = vadd.f32 %v666_v18, %v602_v14  ;;  %v731_v24 = vadd.f32 %v667_v21, %v603_v3  ;;  %v547_v3 = vld [vmem:[#allocation2 + $0x1f8] sm:$0xff] }
 0x20f   :  { %794 = vst [vmem:[#allocation6 + $0x1b0] sm:$0xff] %v730_v23  ;;  %v865_v42 = vmul.f32 %v730_v23, %v474_v17  ;;  %v866_v53 = vmul.f32 %v731_v24, %v475_v19  ;;  %v610_v19 = vmul.f32 0.9, %v546_v16  ;;  %v611_v23 = vmul.f32 0.9, %v547_v3 }
 0x210   :  { %795 = vst [vmem:[#allocation6 + $0x1b8] sm:$0xff] %v731_v24  ;;  %v295_v15 = vpop.f32.mrf.mxu2  ;;  %v408_v31 = vpop.f32.mrf.mxu3 }
 0x211   :  { %v476_v20 = vmul.f32 0.125, %v295_v15  ;;  %v477_v34 = vmul.f32 0.125, %v408_v31  ;;  %v928_v49 = vadd.f32 %v927_v32, %v865_v42 }
 0x213   :  { %v668_v37 = vmul.f32 0.1, %v476_v20  ;;  %v669_v39 = vmul.f32 0.1, %v477_v34  ;;  %v929_v46 = vadd.f32 %v928_v49, %v866_v53 }
 0x215   :  { %v732_v43 = vadd.f32 %v668_v37, %v604_v25  ;;  %v733_v44 = vadd.f32 %v669_v39, %v605_v35 }
 0x217   :  { %796 = vst [vmem:[#allocation6 + $0x1c0] sm:$0xff] %v732_v43  ;;  %v867_v57 = vmul.f32 %v732_v43, %v476_v20  ;;  %v868_v4 = vmul.f32 %v733_v44, %v477_v34 }
 0x218   :  { %797 = vst [vmem:[#allocation6 + $0x1c8] sm:$0xff] %v733_v44  ;;  %v298_v38 = vpop.f32.mrf.mxu2  ;;  %v411_v48 = vpop.f32.mrf.mxu3 }
 0x219   :  { %v478_v50 = vmul.f32 0.125, %v298_v38  ;;  %v479_v51 = vmul.f32 0.125, %v411_v48  ;;  %v930_v63 = vadd.f32 %v929_v46, %v867_v57 }
 0x21b   :  { %v670_v59 = vmul.f32 0.1, %v478_v50  ;;  %v671_v40 = vmul.f32 0.1, %v479_v51  ;;  %v931_v6 = vadd.f32 %v930_v63, %v868_v4 }
 0x21d   :  { %v734_v54 = vadd.f32 %v670_v59, %v606_v45  ;;  %v735_v61 = vadd.f32 %v671_v40, %v607_v52 }
 0x21f   :  { %798 = vst [vmem:[#allocation6 + $0x1d0] sm:$0xff] %v734_v54  ;;  %v869_v5 = vmul.f32 %v734_v54, %v478_v50  ;;  %v870_v8 = vmul.f32 %v735_v61, %v479_v51 }
 0x220   :  { %799 = vst [vmem:[#allocation6 + $0x1d8] sm:$0xff] %v735_v61  ;;  %v301_v55 = vpop.f32.mrf.mxu2  ;;  %v414_v1 = vpop.f32.mrf.mxu3 }
 0x221   :  { %v480_v58 = vmul.f32 0.125, %v301_v55  ;;  %v481_v0 = vmul.f32 0.125, %v414_v1  ;;  %v932_v10 = vadd.f32 %v931_v6, %v869_v5 }
 0x223   :  { %v672_v7 = vmul.f32 0.1, %v480_v58  ;;  %v673_v9 = vmul.f32 0.1, %v481_v0  ;;  %v933_v18 = vadd.f32 %v932_v10, %v870_v8 }
 0x225   :  { %v736_v12 = vadd.f32 %v672_v7, %v608_v60  ;;  %v737_v14 = vadd.f32 %v673_v9, %v609_v2 }
 0x227   :  { %800 = vst [vmem:[#allocation6 + $0x1e0] sm:$0xff] %v736_v12  ;;  %v871_v13 = vmul.f32 %v736_v12, %v480_v58  ;;  %v872_v29 = vmul.f32 %v737_v14, %v481_v0 }
 0x228   :  { %801 = vst [vmem:[#allocation6 + $0x1e8] sm:$0xff] %v737_v14  ;;  %v304_v17 = vpop.f32.mrf.mxu2  ;;  %v417_v11 = vpop.f32.mrf.mxu3 }
 0x229   :  { %v482_v21 = vmul.f32 0.125, %v304_v17  ;;  %v483_v22 = vmul.f32 0.125, %v417_v11  ;;  %v934_v24 = vadd.f32 %v933_v18, %v871_v13 }
 0x22b   :  { %v674_v26 = vmul.f32 0.1, %v482_v21  ;;  %v675_v28 = vmul.f32 0.1, %v483_v22  ;;  %v935_v31 = vadd.f32 %v934_v24, %v872_v29 }
 0x22d   :  { %v738_v30 = vadd.f32 %v674_v26, %v610_v19  ;;  %v739_v15 = vadd.f32 %v675_v28, %v611_v23 }
 0x22f   :  { %802 = vst [vmem:[#allocation6 + $0x1f0] sm:$0xff] %v738_v30  ;;  %v873_v25 = vmul.f32 %v738_v30, %v482_v21  ;;  %v874_v33 = vmul.f32 %v739_v15, %v483_v22 }
 0x230   :  { %803 = vst [vmem:[#allocation6 + $0x1f8] sm:$0xff] %v739_v15 }
 0x231   :  { %v936_v20 = vadd.f32 %v935_v31, %v873_v25  ;;  %962 = dma.vmem_to_hbm [thread:$0]  %s955_s25, 8192, %s957_s23, [#allocation4], %s1126_s17, %s1126_s17, %s1127_s18  }
 0x233   :  { %v937_v34 = vadd.f32 %v936_v20, %v874_v33 }
 0x235   :  { %938 = vadd.xlane.f32.xlu1 %v937_v34 }
 0x2a8   :  { %v939_v35 = vpop.xlane.xlu1 %938 }
 0x2a9   :  { %v940_v36 = vrot.slane %v939_v35, 4 }
 0x2ab   :  { %v941_v37 = vadd.f32 %v940_v36, %v939_v35 }
 0x2ad   :  { %v942_v39 = vrot.slane %v941_v37, 2 }
 0x2af   :  { %v943_v41 = vadd.f32 %v942_v39, %v941_v37 }
 0x2b1   :  { %v944_v42 = vrot.slane %v943_v41, 1 }
 0x2b3   :  { %v945_v43 = vadd.f32 %v944_v42, %v943_v41 }
 0x2b5   :  { %1050 = vpush %v945_v43 }
 0x2e6   :  { %s1051_s28 = spop %1050 }
 0x2e7   :  { %949 = sst [smem:[#allocation7]] %s1051_s28 }
 0x2e8   :  { %971 = dma.smem_to_hbm %s1129_s29, 16, %s969_s2, [#allocation5]  }
 0x2e9   :  { %1121 = dma.done.wait [#allocation4], 8192  }
 0x2ea   :  { %1122 = vsyncadd [#allocation4], 4294959104 }
 0x2eb   :  { %1123 = dma.done.wait [#allocation5], 16  }
 0x2ec   :  { %1124 = vsyncadd [#allocation5], 4294967280 }
 0x2ed   :  { %980 = sfence }
 0x2ee   :  { %981 = vsyncpa [#allocation3], 1 }
 0x2ef   :  { %982 = vsyncpa [#allocation4], 1 }
 0x2f0   :  { %983 = vsyncpa [#allocation5], 1 }

</bundles_post_ra>
